<compile_context>
chip_gen: v5e
topology: v5e:2x2
jax: 0.10.0
libtpu: 0.0.40
codegen_flags: <defaults>
</compile_context>

<pallas_src>
import math

import jax
import jax.numpy as jnp
from jax.experimental import pallas as pl
from jax.experimental.pallas import tpu as pltpu


def _round_down(v, m):
    return (v // m) * m


def _round_up(v, m):
    return ((v + m - 1) // m) * m


def _spectrum_relu_kernel(x_ref, w_ref, b_ref, o_ref):
    # f32 accumulation regardless of x dtype (PyTorch params are f32);
    # weight/bias tiles are (1, lb) and broadcast over the (rb, lb) x tile.
    y = x_ref[...].astype(jnp.float32) * w_ref[...] + b_ref[...]
    o_ref[...] = jnp.maximum(y, 0.0).astype(o_ref.dtype)


def spectrum_relu(x, weight, bias, *, target_block_bytes=2 * 1024 * 1024,
                  donate_x=False):
    """relu(weight * x + bias); weight/bias broadcast from trailing dims of x."""
    sp_ndim = weight.ndim
    assert weight.shape == bias.shape
    assert x.shape[x.ndim - sp_ndim:] == weight.shape, "spatial dims must match"

    S = math.prod(weight.shape)
    lead = math.prod(x.shape[: x.ndim - sp_ndim]) if x.ndim > sp_ndim else 1

    w_flat = weight.reshape(S).astype(jnp.float32)
    b_flat = bias.reshape(S).astype(jnp.float32)

    # ---- Lane-width normalization: make the last dim a multiple of 128 ----
    pad = 0
    if S % 128 == 0:
        rows, L = lead, S
        x2 = x.reshape(rows, L)
        w2, b2 = w_flat, b_flat
    else:
        k = 128 // math.gcd(S, 128)          # smallest k with (k*S) % 128 == 0
        if lead >= k and lead % k == 0:
            # Fold k leading rows into the lane axis; tile weight/bias k times.
            rows, L = lead // k, k * S
            x2 = x.reshape(rows, L)
            w2 = jnp.tile(w_flat, (k,))
            b2 = jnp.tile(b_flat, (k,))
        else:
            # Fallback: pad the lane axis (layout-only; sliced off afterwards).
            pad = (-S) % 128
            rows, L = lead, S + pad
            x2 = jnp.pad(x.reshape(lead, S), ((0, 0), (0, pad)))
            w2 = jnp.pad(w_flat, (0, pad))
            b2 = jnp.pad(b_flat, (0, pad))
    w2 = w2.reshape(1, L)
    b2 = b2.reshape(1, L)

    # ---- Block sizing: ~target_block_bytes per x/out buffer, all gens ----
    itemsize = jnp.dtype(x.dtype).itemsize
    tgt = max(int(target_block_bytes), 8 * 128 * itemsize)

    # Lane block: multiple of 128, capped so even an 8-row block fits budget.
    max_lane = max(128, _round_down(min(tgt // (8 * itemsize), 512 * 128), 128))
    if L <= max_lane:
        lb = L
    else:
        lb = 128
        for cand in range(max_lane, 127, -128):   # prefer a divisor of L
            if L % cand == 0:
                lb = cand
                break

    # Row block: fill the byte budget, multiple of 8.
    rb = max(8, _round_down(max(tgt // (lb * itemsize), 8), 8))
    if rows > 8:
        # Keep >= ~8 row blocks so both v7x cores get work and pipelining
        # stays deep on large inputs.
        parallel_cap = max(8, _round_up(pl.cdiv(rows, 8), 8))
        rb = min(rb, parallel_cap)
    rb = min(rb, max(8, _round_up(rows, 8)))        # never larger than needed

    grid = (pl.cdiv(rows, rb), pl.cdiv(L, lb))

    aliases = {}
    if donate_x and pad == 0:
        aliases = {0: 0}   # x2 and out have identical shape/dtype

    out2 = pl.pallas_call(
        _spectrum_relu_kernel,
        out_shape=jax.ShapeDtypeStruct((rows, L), x.dtype),
        grid=grid,
        in_specs=[
            pl.BlockSpec((rb, lb), lambda i, j: (i, j)),   # x tile
            pl.BlockSpec((1, lb), lambda i, j: (0, j)),    # weight (broadcast)
            pl.BlockSpec((1, lb), lambda i, j: (0, j)),    # bias   (broadcast)
        ],
        out_specs=pl.BlockSpec((rb, lb), lambda i, j: (i, j)),
        compiler_params=pltpu.CompilerParams(
            dimension_semantics=("parallel", "parallel")),
        input_output_aliases=aliases,
    )(x2, w2, b2)

    if pad:
        out2 = out2[:, :S]
    return out2.reshape(x.shape)


# -----------------------------------------------------------------------------
if __name__ == "__main__":
    key = jax.random.PRNGKey(0)
    kx, kw, kb, kx2 = jax.random.split(key, 4)

    # Main check: x = (B, C, H, W), spatial_size = (H, W), lane-dense (H*W=256).
    B, C, H, W = 2, 4, 16, 16
    x = jax.random.normal(kx, (B, C, H, W), jnp.float32)
    weight = 1.0 + 0.5 * jax.random.normal(kw, (H, W), jnp.float32)
    bias = 0.1 * jax.random.normal(kb, (H, W), jnp.float32)

    out = jax.block_until_ready(spectrum_relu(x, weight, bias))
    ref = jnp.maximum(weight * x + bias, 0.0)
    assert out.shape == x.shape
    assert jnp.isfinite(out).all(), "non-finite values in kernel output"
    max_err = float(jnp.max(jnp.abs(out - ref)))
    assert max_err < 1e-6, f"mismatch vs reference: max abs err {max_err}"

    # Secondary check: spatial size not a multiple of 128 (exercises the
    # lane-normalization path).
    H2, W2 = 7, 7
    x_b = jax.random.normal(kx2, (B, C, H2, W2), jnp.float32)
    w_b = 1.0 + 0.5 * jax.random.normal(kw, (H2, W2), jnp.float32)
    b_b = 0.1 * jax.random.normal(kb, (H2, W2), jnp.float32)
    out_b = jax.block_until_ready(spectrum_relu(x_b, w_b, b_b))
    ref_b = jnp.maximum(w_b * x_b + b_b, 0.0)
    max_err_b = float(jnp.max(jnp.abs(out_b - ref_b)))
    assert max_err_b < 1e-6, f"mismatch (non-128 spatial): max abs err {max_err_b}"

    print("KERNEL_OK")
</pallas_src>

<mosaic_0001>
module attributes {stable_mosaic.version = 11 : i64} {
  func.func @_spectrum_relu_kernel(%arg0: i32, %arg1: i32, %arg2: memref<8x256xf32, #tpu.memory_space<vmem>>, %arg3: memref<1x256xf32, #tpu.memory_space<vmem>>, %arg4: memref<1x256xf32, #tpu.memory_space<vmem>>, %arg5: memref<8x256xf32, #tpu.memory_space<vmem>>) attributes {dimension_semantics = [#tpu.dimension_semantics<parallel>, #tpu.dimension_semantics<parallel>], iteration_bounds = array<i64: 1, 1>, scalar_prefetch = 0 : i64, scratch_operands = 0 : i64, tpu.core_type = #tpu.core_type<tc>, window_params = [{transform_indices = @transform_0, window_bounds = array<i64: 8, 256>}, {transform_indices = @transform_1, window_bounds = array<i64: 1, 256>}, {transform_indices = @transform_2, window_bounds = array<i64: 1, 256>}, {transform_indices = @transform_3, window_bounds = array<i64: 8, 256>}]} {
    %c0 = arith.constant 0 : index
    %c0_0 = arith.constant 0 : index
    %0 = vector.load %arg2[%c0, %c0_0] : memref<8x256xf32, #tpu.memory_space<vmem>>, vector<8x256xf32>
    %c0_1 = arith.constant 0 : index
    %c0_2 = arith.constant 0 : index
    %1 = vector.load %arg3[%c0_1, %c0_2] : memref<1x256xf32, #tpu.memory_space<vmem>>, vector<1x256xf32>
    %2 = vector.broadcast %1 : vector<1x256xf32> to vector<8x256xf32>
    %3 = arith.mulf %0, %2 : vector<8x256xf32>
    %c0_3 = arith.constant 0 : index
    %c0_4 = arith.constant 0 : index
    %4 = vector.load %arg4[%c0_3, %c0_4] : memref<1x256xf32, #tpu.memory_space<vmem>>, vector<1x256xf32>
    %5 = vector.broadcast %4 : vector<1x256xf32> to vector<8x256xf32>
    %6 = arith.addf %3, %5 : vector<8x256xf32>
    %cst = arith.constant 0.000000e+00 : f32
    %7 = vector.broadcast %cst : f32 to vector<8x256xf32>
    %8 = arith.maximumf %6, %7 : vector<8x256xf32>
    %c0_5 = arith.constant 0 : index
    %c0_6 = arith.constant 0 : index
    %9 = vector.load %arg5[%c0_5, %c0_6] : memref<8x256xf32, #tpu.memory_space<vmem>>, vector<8x256xf32>
    tpu.vector_store %arg5[%c0_5, %c0_6], %8 {strides = array<i32>} : memref<8x256xf32, #tpu.memory_space<vmem>>, vector<8x256xf32>,
    return
  }
  func.func @transform_0(%arg0: i32, %arg1: i32) -> (i32, i32) {
    %c0_i32 = arith.constant 0 : i32
    return %arg0, %arg1 : i32, i32
  }
  func.func @transform_1(%arg0: i32, %arg1: i32) -> (i32, i32) {
    %c0_i32 = arith.constant 0 : i32
    %c0_i32_0 = arith.constant 0 : i32
    return %c0_i32, %arg1 : i32, i32
  }
  func.func @transform_2(%arg0: i32, %arg1: i32) -> (i32, i32) {
    %c0_i32 = arith.constant 0 : i32
    %c0_i32_0 = arith.constant 0 : i32
    return %c0_i32, %arg1 : i32, i32
  }
  func.func @transform_3(%arg0: i32, %arg1: i32) -> (i32, i32) {
    %c0_i32 = arith.constant 0 : i32
    return %arg0, %arg1 : i32, i32
  }
}

</mosaic_0001>

<bundles_post_ra>
// kernel: tpu_custom_call.1
= control target key start
LH: loop header
LB: loop body
LE: loop exit
PB: predicated region body
PF: predicated region fallthrough
CT: control target
= control target key end

     0   :  { %8 = vsyncpa [#allocation3], 0  ;;  %s238_s0 = inlined_call_operand.hbm [shape: f32[8,256], index: 0, kind: input, shape index: {}]   ;;  %s239_s1 = inlined_call_operand.hbm [shape: f32[1,256], index: 1, kind: input, shape index: {}]   ;;  %s240_s2 = inlined_call_operand.hbm [shape: f32[1,256], index: 2, kind: input, shape index: {}]   ;;  %s241_s3 = inlined_call_operand.hbm [shape: f32[8,256], index: 3, kind: output, shape index: {}]  }
   0x1   :  { %9 = vsyncpa [#allocation6], 0  ;;  %s27_s14 = sshll.u32 %s239_s1, 4  ;;  %s28_s14 = int_to_ptr.hbm [resolvable:$true] %s27_s14 }
   0x2   :  { %10 = vsyncpa [#allocation4], 0  ;;  %s202_s15 = smov [#allocation5]   ;;  %s16_s19 = sshll.u32 %s238_s0, 4  ;;  %s17_s19 = int_to_ptr.hbm [resolvable:$true] %s16_s19 }
   0x3   :  { %s29_s16 = sshll.u32 %s202_s15, 4  ;;  %s203_s20 = smov [#allocation2]   ;;  %s30_s16 = int_to_ptr.vmem [resolvable:$true] %s29_s16 }
   0x4   :  { %32 = dma.hbm_to_vmem [thread:$0]  %s28_s14, 32, %s30_s16, [#allocation6]  }
   0x5   :  { %s18_s21 = sshll.u32 %s203_s20, 4  ;;  %s38_s24 = sshll.u32 %s240_s2, 4  ;;  %s19_s21 = int_to_ptr.vmem [resolvable:$true] %s18_s21  ;;  %s39_s24 = int_to_ptr.hbm [resolvable:$true] %s38_s24 }
   0x6   :  { %21 = dma.hbm_to_vmem [thread:$0]  %s17_s19, 256, %s19_s21, [#allocation3]  }
   0x7   :  { %s204_s1 = smov [#allocation7]  }
   0x8   :  { %s40_s25 = sshll.u32 %s204_s1, 4  ;;  %s41_s25 = int_to_ptr.vmem [resolvable:$true] %s40_s25 }
   0x9   :  { %43 = dma.hbm_to_vmem [thread:$0]  %s39_s24, 32, %s41_s25, [#allocation6]  }
   0xa   :  { %196 = dma.done.wait [#allocation3], 256  }
   0xb   :  { %197 = vsyncadd [#allocation3], 4294967040 }
   0xc   :  { %198 = dma.done.wait [#allocation6], 64  }
   0xd   :  { %199 = vsyncadd [#allocation6], 4294967232  ;;  %v56_v0 = vld [vmem:[#allocation2] sm:$0xff]  ;;  %v58_v1 = vld [vmem:[#allocation5] sm:$0x3]  ;;  %s205_s0 = smov [#allocation8]  }
   0xe   :  { %v66_v2 = vld [vmem:[#allocation7] sm:$0x3]  ;;  %v60_v3 = vperm.slane %v58_v1, 0  ;;  %v57_v5 = vld [vmem:[#allocation2 + $0x8] sm:$0xff]  ;;  %v61_v6 = vperm.slane %v58_v1, 1  ;;  %s83_s2 = sshll.u32 %s205_s0, 4  ;;  %s84_s2 = int_to_ptr.vmem [resolvable:$true] %s83_s2 }
   0xf   :  { %v68_v4 = vperm.slane %v66_v2, 0  ;;  %v69_v7 = vperm.slane %v66_v2, 1  ;;  %s85_s28 = sshll.u32 %s241_s3, 4  ;;  %s86_s28 = int_to_ptr.hbm [resolvable:$true] %s85_s28 }
  0x10   :  { %v64_v8 = vmul.f32 %v60_v3, %v56_v0  ;;  %v65_v9 = vmul.f32 %v61_v6, %v57_v5 }
  0x12   :  { %v72_v10 = vadd.f32 %v68_v4, %v64_v8  ;;  %v73_v11 = vadd.f32 %v69_v7, %v65_v9 }
  0x14   :  { %v74_v12 = vmax.f32 %v72_v10, 0.0  ;;  %v75_v13 = vmax.f32 %v73_v11, 0.0 }
  0x16   :  { %76 = vst [vmem:[#allocation8] sm:$0xff] %v74_v12 }
  0x17   :  { %77 = vst [vmem:[#allocation8 + $0x8] sm:$0xff] %v75_v13 }
  0x18   :  { %88 = dma.vmem_to_hbm [thread:$0]  %s84_s2, 256, %s86_s28, [#allocation4]  }
  0x19   :  { %200 = dma.done.wait [#allocation4], 256  }
  0x1a   :  { %201 = vsyncadd [#allocation4], 4294967040 }
  0x1b   :  { %93 = vsyncpa [#allocation3], 1 }
  0x1c   :  { %94 = vsyncpa [#allocation6], 1 }
  0x1d   :  { %95 = vsyncpa [#allocation4], 1 }

</bundles_post_ra>
